<compile_context>
chip_gen: v6e
topology: v6e:2x2x1
jax: 0.10.0
libtpu: 0.0.40
codegen_flags: <defaults>
</compile_context>

<pallas_src>
import math

import numpy as np
import jax
import jax.numpy as jnp
from jax.experimental import pallas as pl
from jax.experimental.pallas import tpu as pltpu


def _sinusoid_kernel(t_ref, freq_ref, phase_ref, o_ref):
    """t_ref: (TILE_B, 1) f32, freq_ref/phase_ref: (1, D) f32, o_ref: (TILE_B, D)."""
    # VPU broadcast multiply-add, EUP sin, single lane-dense full-width store.
    arg = t_ref[...] * freq_ref[...] + phase_ref[...]
    o_ref[...] = jnp.sin(arg).astype(o_ref.dtype)


def _freq_table(embedding_dim: int) -> np.ndarray:
    """Static frequency table, identical to the PyTorch module's exp(arange * -emb)."""
    half = embedding_dim // 2
    emb = math.log(10000.0) / (half - 1)
    return np.exp(np.arange(half, dtype=np.float64) * -emb).astype(np.float32)


def sinusoidal_position_embedding(timesteps: jax.Array,
                                  embedding_dim: int,
                                  out_dtype=jnp.float32) -> jax.Array:
    """Pallas TPU implementation of SinusoidalPositionEmbedding.forward.

    Args:
      timesteps: (B,) array (any float/int dtype; cast to float32).
      embedding_dim: even embedding dimension, >= 4.
      out_dtype: output dtype; keep float32 to match PyTorch.  Pass bfloat16 only
        if the consumer (timestep MLP) accepts it — halves HBM writeback bytes
        (biggest win on v5e).  Arithmetic is always done in float32.

    Returns:
      (B, embedding_dim): [:, :half] = sin(t * f_k), [:, half:] = cos(t * f_k)
      (cos computed as sin(x + pi/2) so the store is a single full-width vst).
    """
    assert embedding_dim % 2 == 0, "embedding_dim must be even"
    assert embedding_dim >= 4, "embedding_dim must be >= 4 (half - 1 division)"
    half = embedding_dim // 2

    B = timesteps.shape[0]
    t2d = jnp.asarray(timesteps).astype(jnp.float32).reshape(B, 1)

    # Static tables (trace-time numpy; no in-kernel exp, frees the EUP for sin).
    freqs = _freq_table(embedding_dim)                                  # (half,)
    freqs_full = np.concatenate([freqs, freqs]).reshape(1, embedding_dim)
    phase = np.concatenate([np.zeros(half, np.float32),
                            np.full(half, np.float32(np.pi / 2), np.float32)]
                           ).reshape(1, embedding_dim)
    freqs_full = jnp.asarray(freqs_full)
    phase = jnp.asarray(phase)

    # --- Batch tiling -------------------------------------------------------
    # VMEM-aware row cap: double-buffered output tile <= ~8 MiB (fits the 16 MiB
    # scoped default on v5e and the 32 MiB defaults on v6e/v7x, inputs are tiny).
    out_row_bytes = embedding_dim * jnp.dtype(out_dtype).itemsize
    vmem_budget = 8 << 20
    cap_vmem = max(8, (vmem_budget // (2 * out_row_bytes)) // 8 * 8)
    cap = min(1024, cap_vmem)
    # At least 2 grid steps when B allows, so the "parallel" axis shards across
    # both v7x TensorCores (no effect on v5e/v6e: 1 TC).
    tile_b = min(cap, max(8, ((pl.cdiv(B, 2) + 7) // 8) * 8))
    grid = (pl.cdiv(B, tile_b),)

    # No padding / post-slice: out_shape is exactly (B, D); Pallas masks the
    # ragged last block (tile_b is a multiple of 8, D is the full last dim).
    out = pl.pallas_call(
        _sinusoid_kernel,
        out_shape=jax.ShapeDtypeStruct((B, embedding_dim), out_dtype),
        grid=grid,
        in_specs=[
            pl.BlockSpec((tile_b, 1), lambda i: (i, 0)),
            pl.BlockSpec((1, embedding_dim), lambda i: (0, 0)),   # resident
            pl.BlockSpec((1, embedding_dim), lambda i: (0, 0)),   # resident
        ],
        out_specs=pl.BlockSpec((tile_b, embedding_dim), lambda i: (i, 0)),
        compiler_params=pltpu.CompilerParams(dimension_semantics=("parallel",)),
    )(t2d, freqs_full, phase)
    return out


def _reference(timesteps: jax.Array, embedding_dim: int) -> jax.Array:
    """Pure-JAX reference with the same PyTorch semantics (true cos, not phase trick)."""
    half = embedding_dim // 2
    freqs = jnp.asarray(_freq_table(embedding_dim))
    arg = timesteps.astype(jnp.float32)[:, None] * freqs[None, :]
    return jnp.concatenate([jnp.sin(arg), jnp.cos(arg)], axis=-1)


if __name__ == "__main__":
    key = jax.random.PRNGKey(0)
    B = 8
    embedding_dim = 32
    # Diffusion timesteps: integers in [0, 1000).
    timesteps = jax.random.randint(key, (B,), 0, 1000).astype(jnp.float32)

    out = sinusoidal_position_embedding(timesteps, embedding_dim)
    out = jax.block_until_ready(out)

    ref = _reference(timesteps, embedding_dim)
    assert out.shape == (B, embedding_dim)
    assert out.dtype == jnp.float32
    # Tolerance covers f32 sin/cos range reduction of arguments up to ~1000 and
    # the sin(x + pi/2) == cos(x) identity in f32.
    assert jnp.allclose(out, ref, atol=2e-3, rtol=2e-3), "mismatch vs reference"

    # Ragged-batch path (no padding / post-slice): B not a multiple of the tile.
    B2 = 13
    t2 = jax.random.randint(jax.random.PRNGKey(1), (B2,), 0, 1000).astype(jnp.float32)
    out2 = jax.block_until_ready(sinusoidal_position_embedding(t2, embedding_dim))
    ref2 = _reference(t2, embedding_dim)
    assert out2.shape == (B2, embedding_dim)
    assert jnp.allclose(out2, ref2, atol=2e-3, rtol=2e-3), "mismatch vs reference (ragged B)"

    print("KERNEL_OK")
</pallas_src>

<mosaic_0001>
module attributes {stable_mosaic.version = 11 : i64} {
  func.func @_sinusoid_kernel(%arg0: i32, %arg1: memref<8x1xf32, #tpu.memory_space<vmem>>, %arg2: memref<1x32xf32, #tpu.memory_space<vmem>>, %arg3: memref<1x32xf32, #tpu.memory_space<vmem>>, %arg4: memref<8x32xf32, #tpu.memory_space<vmem>>) attributes {dimension_semantics = [#tpu.dimension_semantics<parallel>], iteration_bounds = array<i64: 1>, scalar_prefetch = 0 : i64, scratch_operands = 0 : i64, tpu.core_type = #tpu.core_type<tc>, window_params = [{transform_indices = @transform_0, window_bounds = array<i64: 8, 1>}, {pipeline_mode = #tpu.pipeline_mode<synchronous>, transform_indices = @transform_1, window_bounds = array<i64: 1, 32>}, {pipeline_mode = #tpu.pipeline_mode<synchronous>, transform_indices = @transform_2, window_bounds = array<i64: 1, 32>}, {transform_indices = @transform_3, window_bounds = array<i64: 8, 32>}]} {
    %c0 = arith.constant 0 : index
    %c0_0 = arith.constant 0 : index
    %0 = vector.load %arg1[%c0, %c0_0] : memref<8x1xf32, #tpu.memory_space<vmem>>, vector<8x1xf32>
    %c0_1 = arith.constant 0 : index
    %c0_2 = arith.constant 0 : index
    %1 = vector.load %arg2[%c0_1, %c0_2] : memref<1x32xf32, #tpu.memory_space<vmem>>, vector<1x32xf32>
    %2 = vector.broadcast %0 : vector<8x1xf32> to vector<8x32xf32>
    %3 = vector.broadcast %1 : vector<1x32xf32> to vector<8x32xf32>
    %4 = arith.mulf %2, %3 : vector<8x32xf32>
    %c0_3 = arith.constant 0 : index
    %c0_4 = arith.constant 0 : index
    %5 = vector.load %arg3[%c0_3, %c0_4] : memref<1x32xf32, #tpu.memory_space<vmem>>, vector<1x32xf32>
    %6 = vector.broadcast %5 : vector<1x32xf32> to vector<8x32xf32>
    %7 = arith.addf %4, %6 : vector<8x32xf32>
    %8 = math.sin %7 : vector<8x32xf32>
    %c0_5 = arith.constant 0 : index
    %c0_6 = arith.constant 0 : index
    %9 = vector.load %arg4[%c0_5, %c0_6] : memref<8x32xf32, #tpu.memory_space<vmem>>, vector<8x32xf32>
    tpu.vector_store %arg4[%c0_5, %c0_6], %8 {strides = array<i32>} : memref<8x32xf32, #tpu.memory_space<vmem>>, vector<8x32xf32>,
    return
  }
  func.func @transform_0(%arg0: i32) -> (i32, i32) {
    %c0_i32 = arith.constant 0 : i32
    %c0_i32_0 = arith.constant 0 : i32
    return %arg0, %c0_i32 : i32, i32
  }
  func.func @transform_1(%arg0: i32) -> (i32, i32) {
    %c0_i32 = arith.constant 0 : i32
    %c0_i32_0 = arith.constant 0 : i32
    %c0_i32_1 = arith.constant 0 : i32
    return %c0_i32, %c0_i32_0 : i32, i32
  }
  func.func @transform_2(%arg0: i32) -> (i32, i32) {
    %c0_i32 = arith.constant 0 : i32
    %c0_i32_0 = arith.constant 0 : i32
    %c0_i32_1 = arith.constant 0 : i32
    return %c0_i32, %c0_i32_0 : i32, i32
  }
  func.func @transform_3(%arg0: i32) -> (i32, i32) {
    %c0_i32 = arith.constant 0 : i32
    %c0_i32_0 = arith.constant 0 : i32
    return %arg0, %c0_i32 : i32, i32
  }
}

</mosaic_0001>

<bundles_post_ra>
// kernel: tpu_custom_call.1
= control target key start
LH: loop header
LB: loop body
LE: loop exit
PB: predicated region body
PF: predicated region fallthrough
CT: control target
= control target key end

     0   :  { %v202_v1 = vmov 0   ;;  %s263_s0 = inlined_call_operand.vmem [shape: f32[8,1], index: 0, kind: input, shape index: {}]   ;;  %s264_s1 = inlined_call_operand.vmem [shape: f32[1,32], index: 1, kind: input, shape index: {}]   ;;  %s265_s2 = inlined_call_operand.vmem [shape: f32[1,32], index: 2, kind: input, shape index: {}]   ;;  %s266_s3 = inlined_call_operand.hbm [shape: f32[8,32], index: 3, kind: output, shape index: {}]  }
   0x1   :  { %v15_v0 = vld [vmem:[%s263_s0] sm:$0xff]  ;;  %175 = vset.pattern.permute.xlu0 %v202_v1 }
   0x2   :  { %19 = vperm.xlu0 %175, %v15_v0  }
   0x3   :  { %8 = vsyncpa [#allocation3], 0  ;;  %v157_v2 = vld [vmem:[%s264_s1] ss:$0 sm:$0xff]  ;;  %v203_v18 = vmov 2102212464  }
   0x4   :  { %v158_v3 = vld [vmem:[%s265_s2] ss:$0 sm:$0xff]  ;;  %v204_v20 = vmov 920167782   ;;  %v205_v24 = vmov 1326507024  }
   0x5   :  { %v206_v26 = vmov 683565275   ;;  %v207_v28 = vmov 2475754826   ;;  %v208_v31 = vmov 2131351028  }
   0x6   :  { %s209_s0 = smov [#allocation2]   ;;  %vm141_vm12 = vcmask 261120  }
   0x7   :  { %s149_s1 = sshll.u32 %s209_s0, 4  ;;  %s150_s1 = int_to_ptr.vmem [resolvable:$true] %s149_s1 }
   0x8   :  { %s180_s2 = scalar_lea.vmem %s150_s1, 128  ;;  %p185_p1 = scmp.lt.s32.totalorder %s150_s1, %s150_s1 }
   0x9   :  { %p181_p0 = scmp.ne.s32.totalorder %s150_s1, %s180_s2  ;;  %p186_p2 = scmp.lt.s32.totalorder %s180_s2, %s180_s2 }
   0xb   :  { %p187_p3 = por %p186_p2, %p185_p1 }
   0xd   :  { %p188_p4 = pnand %p187_p3, %p181_p0 }
  0x7d   :  { %v20_v4 = vpop.permute.xlu0 %19 }
  0x7e   :  { %v28_v5 = vmul.f32 %v157_v2, %v20_v4 }
  0x80   :  { %v239_v6 = vadd.f32 %v158_v3, %v28_v5 }
  0x82   :  { %v40_v7 = vand.u32 2139095040, %v239_v6  ;;  %v37_v8 = vand.u32 2147483647, %v239_v6  ;;  %vm39_vm7 = vcmp.lt.s32.totalorder %v239_v6, 0  ;;  %vm129_vm13 = vweird.f32 %v239_v6 }
  0x84   :  { %v41_v9 = vshrl.u32 %v40_v7, 23  ;;  %v44_v11 = vand.u32 8388607, %v37_v8  ;;  %vm38_vm8 = vcmp.le.f32.partialorder %v37_v8, 0.7853982 }
  0x86   :  { %v159_v10 = vadd.s32 4294967169, %v41_v9  ;;  %v45_v14 = vor.u32 8388608, %v44_v11 }
  0x88   :  { %v47_v12 = vadd.s32 1, %v159_v10  ;;  %v85_v22 = vshll.u32 %v45_v14, 8 }
  0x8a   :  { %vm48_vm0 = vcmp.gt.s32.totalorder %v47_v12, 0 }
  0x8b   :  { %v49_v13 = vsel %vm48_vm0, %v47_v12, 0 }
  0x8c   :  { %v51_v15 = vand.u32 31, %v49_v13  ;;  %v50_v16 = vshrl.u32 %v49_v13, 5 }
  0x8e   :  { %v52_v17 = vsub.s32 32, %v51_v15  ;;  %v63_v19 = vshll.u32 %v203_v18, %v51_v15  ;;  %v66_v21 = vshll.u32 %v204_v20, %v51_v15  ;;  %v54_v27 = vshll.u32 %v206_v26, %v51_v15 }
  0x8f   :  { %v57_v30 = vshll.u32 %v207_v28, %v51_v15  ;;  %v60_v33 = vshll.u32 %v208_v31, %v51_v15  ;;  %vm72_vm1 = vcmp.lt.s32.totalorder %v50_v16, 4  ;;  %vm69_vm2 = vcmp.lt.s32.totalorder %v50_v16, 1 }
  0x90   :  { %v64_v23 = vshrl.u32 %v204_v20, %v52_v17  ;;  %v67_v25 = vshrl.u32 %v205_v24, %v52_v17  ;;  %v55_v29 = vshrl.u32 %v207_v28, %v52_v17  ;;  %v58_v32 = vshrl.u32 %v208_v31, %v52_v17 }
  0x91   :  { %v61_v34 = vshrl.u32 %v203_v18, %v52_v17  ;;  %v53_v38 = vshrl.u32 %v206_v26, %v52_v17  ;;  %vm70_vm3 = vcmp.lt.s32.totalorder %v50_v16, 2  ;;  %vm71_vm4 = vcmp.lt.s32.totalorder %v50_v16, 3 }
  0x92   :  { %v65_v35 = vor.u32 %v64_v23, %v63_v19  ;;  %v68_v36 = vor.u32 %v67_v25, %v66_v21  ;;  %v56_v37 = vor.u32 %v55_v29, %v54_v27  ;;  %v59_v39 = vor.u32 %v58_v32, %v57_v30 }
  0x93   :  { %v62_v40 = vor.u32 %v61_v34, %v60_v33 }
  0x94   :  { %v78_v41 = vsel %vm72_vm1, %v65_v35, 920167782  ;;  %v82_v42 = vsel %vm72_vm1, %v68_v36, 1326507024  ;;  %v77_v44 = vsel %vm69_vm2, %v56_v37, %v59_v39  ;;  %v73_v47 = vsel %vm69_vm2, %v53_v38, %v56_v37 }
  0x95   :  { %v74_v43 = vsel %vm72_vm1, %v62_v40, 2102212464  ;;  %v79_v45 = vsel %vm71_vm4, %v62_v40, %v78_v41  ;;  %v81_v46 = vsel %vm69_vm2, %v59_v39, %v62_v40  ;;  %v83_v50 = vsel %vm71_vm4, %v65_v35, %v82_v42 }
  0x96   :  { %v75_v48 = vsel %vm71_vm4, %v59_v39, %v74_v43  ;;  %v80_v49 = vsel %vm70_vm3, %v77_v44, %v79_v45  ;;  %v84_v51 = vsel %vm70_vm3, %v81_v46, %v83_v50 }
  0x97   :  { %v245_v52 = vmul.u32.u64.low %v85_v22, %v80_v49  ;;  %v246_v53 = vmul.u32.u64.high %v85_v22, %v80_v49, %v245_v52  ;;  %v248_v54 = vmul.u32.u64.low %v85_v22, %v84_v51  ;;  %v249_v55 = vmul.u32.u64.high %v85_v22, %v84_v51, %v248_v54 }
  0x98   :  { %v76_v56 = vsel %vm70_vm3, %v73_v47, %v75_v48 }
  0x99   :  { %v95_v57 = vadd.s32 1, %v246_v53  ;;  %v92_v58 = vmul.u32 %v85_v22, %v76_v56  ;;  %vm94_vm5 = vc.u32 %v249_v55, %v245_v52  ;;  %v93_v7 = vadd.s32 %v245_v52, %v249_v55 }
  0x9b   :  { %v96_v59 = vsel %vm94_vm5, %v95_v57, %v246_v53 }
  0x9c   :  { %v97_v60 = vadd.s32 %v96_v59, %v92_v58 }
  0x9e   :  { %v98_v61 = vadd.s32 536870912, %v97_v60 }
  0xa0   :  { %v99_v62 = vshrl.u32 %v98_v61, 30 }
  0xa2   :  { %v100_v63 = vshll.u32 %v99_v62, 30  ;;  %v123_v21 = vsub.s32 4, %v99_v62 }
  0xa4   :  { %v101_v0 = vsub.s32 %v97_v60, %v100_v63  ;;  %v124_v24 = vsel %vm39_vm7, %v123_v21, %v99_v62 }
  0xa5   :  { %v126_v25 = vsel %vm38_vm8, 0, %v124_v24 }
  0xa6   :  { %v103_v1 = vsub.s32 0, %v101_v0  ;;  %v130_v26 = vadd.s32 3, %v126_v25 }
  0xa8   :  { %v160_v2 = vmin.u32 %v103_v1, %v101_v0  ;;  %v131_v27 = vand.u32 3, %v130_v26 }
  0xaa   :  { %v105_v3 = vclz %v160_v2  ;;  %vm136_vm9 = vcmp.eq.s32.totalorder %v131_v27, 2  ;;  %vm133_vm10 = vcmp.eq.s32.totalorder %v131_v27, 0  ;;  %vm132_vm11 = vcmp.lt.s32.totalorder %v131_v27, 2 }
  0xac   :  { %v161_v4 = vadd.s32 4294967294, %v105_v3 }
  0xae   :  { %vm162_vm6 = vcmp.lt.s32.totalorder %v161_v4, 0 }
  0xaf   :  { %v108_v5 = vsel %vm162_vm6, 0, %v161_v4 }
  0xb0   :  { %v109_v9 = vsub.s32 32, %v108_v5  ;;  %v113_v10 = vsub.s32 4294967266, %v108_v5  ;;  %v110_v11 = vshll.u32 %v101_v0, %v108_v5 }
  0xb2   :  { %v111_v12 = vshrl.u32 %v93_v7, %v109_v9  ;;  %v114_v13 = vadd.s32 127, %v113_v10 }
  0xb4   :  { %v112_v14 = vor.u32 %v111_v12, %v110_v11  ;;  %v115_v15 = vshll.u32 %v114_v13, 23 }
  0xb6   :  { %v116_v16 = vor.u32 4788187, %v115_v15  ;;  %v119_v18 = vcvt.s32.f32 %v112_v14 }
  0xb8   :  { %v117_v17 = vand.u32 2147483647, %v116_v16 }
  0xba   :  { %v120_v19 = vmul.f32 %v119_v18, %v117_v17 }
  0xbc   :  { %v121_v20 = vxor.u32 2147483648, %v120_v19 }
  0xbe   :  { %v122_v22 = vsel %vm39_vm7, %v121_v20, %v120_v19 }
  0xbf   :  { %v125_v23 = vsel %vm38_vm8, %v239_v6, %v122_v22 }
  0xc0   :  { %176 = vcosq.f32 %v125_v23 }
  0xc1   :  { %178 = vsinq.f32 %v125_v23 }
  0xcd   :  { %v177_v28 = vpop.eup %176 }
  0xce   :  { %v179_v29 = vpop.eup %178  ;;  %v137_v30 = vxor.u32 2147483648, %v177_v28 }
  0xcf   :  { %v134_v31 = vxor.u32 2147483648, %v179_v29 }
  0xd0   :  { %v138_v32 = vsel %vm136_vm9, %v137_v30, %v179_v29 }
  0xd1   :  { %v135_v8 = vsel %vm133_vm10, %v177_v28, %v134_v31 }
  0xd2   :  { %v139_v33 = vsel %vm132_vm11, %v135_v8, %v138_v32 }
  0xd3   :  { %v140_v34 = vsel %vm129_vm13, nan, %v139_v33 }
  0xd4   :  { %142 = vst.msk [vmem:[#allocation2] sm:$0xff] %vm141_vm12, %v140_v34 }
  0xd5   :  { %191 = shalt.err (!%p188_p4)
}
  0xd6   :  { %152 = dma.vmem_to_hbm [thread:$0]  %s150_s1, 128, %s266_s3, [#allocation3]  }
  0xd7   :  { %200 = dma.done.wait [#allocation3], 128  }
  0xd8   :  { %201 = vsyncadd [#allocation3], 4294967168 }
  0xd9   :  { %156 = vsyncpa [#allocation3], 1 }

</bundles_post_ra>
